<compile_context>
chip_gen: v5e
topology: v5e:2x2
jax: 0.10.0
libtpu: 0.0.40
codegen_flags: <defaults>
</compile_context>

<pallas_src>
import functools
import numpy as np
import jax
import jax.numpy as jnp
from jax.experimental import pallas as pl
from jax.experimental.pallas import tpu as pltpu


# --------------------------------------------------------------------------- #
# MADE mask construction (plain numpy, identical logic to torchkit).
# --------------------------------------------------------------------------- #
def get_mask_from_ranks(r1, r2):
    return (r2[:, None] >= r1[None, :]).astype('float32')


def get_rank(max_rank, num_out):
    rank_out = np.array([])
    while len(rank_out) < num_out:
        rank_out = np.concatenate([rank_out, np.arange(max_rank)])
    excess = len(rank_out) - num_out
    remove_ind = np.random.choice(max_rank, excess, False)
    rank_out = np.delete(rank_out, remove_ind)
    np.random.shuffle(rank_out)
    return rank_out.astype('float32')


def get_masks_all(ds, fixed_order=False, derank=1):
    dx = ds[0]
    ms = []
    rx = get_rank(dx, dx)
    if fixed_order:
        rx = np.sort(rx)
    r1 = rx
    if dx != 1:
        for d in ds[1:-1]:
            r2 = get_rank(dx - derank, d)
            ms.append(get_mask_from_ranks(r1, r2))
            r1 = r2
        r2 = rx - derank
        ms.append(get_mask_from_ranks(r1, r2))
    else:
        ms = [np.zeros([ds[i + 1], ds[i]]).astype('float32')
              for i in range(len(ds) - 1)]
    if derank == 1:
        assert np.all(np.diag(functools.reduce(np.dot, ms[::-1])) == 0), 'wrong masks'
    return ms, rx


def get_masks(dim, dh, num_layers, num_outlayers, fixed_order=False, derank=1):
    ms, rx = get_masks_all([dim] + [dh] * (num_layers - 1) + [dim],
                           fixed_order, derank)
    ml = ms[-1]                                               # (dim, dh)
    ml_ = np.broadcast_to(ml.T[:, :, None], (dh, dim, num_outlayers))
    ml_ = np.ascontiguousarray(ml_).reshape(dh, dim * num_outlayers).T
    ms[-1] = ml_.astype('float32')                            # (dim*num_outlayers, dh)
    return ms, rx


def _round_up(n, m):
    return ((n + m - 1) // m) * m


# --------------------------------------------------------------------------- #
# Pallas kernel: the whole cMADE forward for one batch tile, weights resident.
# --------------------------------------------------------------------------- #
def _make_cmade_kernel(num_layers, dp0, sb_offsets, dout_pads, fused_ctx_proj):
    """All arguments are static Python values baked into the traced kernel."""

    def _mm(a, b):
        return jax.lax.dot_general(a, b, (((1,), (0,)), ((), ())),
                                   preferred_element_type=jnp.float32)

    def kernel(xc_ref, wcomb_ref, *rest):
        out_ref = rest[-1]
        w_refs = rest[:-1]                      # weights of layers 1..num_layers-1
        cdt = xc_ref.dtype                      # MXU input dtype (bf16)

        xc = xc_ref[...]                        # (TB, dim + ctx + 1)

        if fused_ctx_proj:
            # One MXU matmul -> [layer-0 pre-activation | every layer's scale & bias].
            z0sb = _mm(xc, wcomb_ref[...])      # (TB, dp0 + total) f32

            def z0():
                return z0sb[:, :dp0]

            def scale_bias(i):
                off = dp0 + sb_offsets[i]
                dp = dout_pads[i]
                return z0sb[:, off:off + dp], z0sb[:, off + dp:off + 2 * dp]
        else:
            # Per-layer scale/bias from 128-aligned column slices of the resident
            # weight: peak f32 scratch drops from TB*total to TB*2*max(dout_pad).
            def z0():
                return _mm(xc, wcomb_ref[:, :dp0])

            def scale_bias(i):
                off = dp0 + sb_offsets[i]
                dp = dout_pads[i]
                sb = _mm(xc, wcomb_ref[:, off:off + 2 * dp])
                return sb[:, :dp], sb[:, dp:]

        h = None
        for i in range(num_layers):
            z = z0() if i == 0 else _mm(h, w_refs[i - 1][...])
            scale, bias = scale_bias(i)
            a = scale * z + bias                              # f32 elementwise (v5e-safe)
            if i < num_layers - 1:
                # ELU(alpha=1): a if a > 0 else exp(a) - 1   (exp -> EUP slot)
                a = jnp.where(a > 0.0, a, jnp.exp(jnp.minimum(a, 0.0)) - 1.0)
                h = a.astype(cdt)                             # bf16 only feeds the MXU
            else:
                out_ref[...] = a

    return kernel


# --------------------------------------------------------------------------- #
# Batch-independent weight preprocessing (hoist out of the per-call hot path).
# --------------------------------------------------------------------------- #
def cmade_preprocess(params, dim, num_outlayers, *,
                     compute_dtype=jnp.bfloat16, lane=128, eps=1e-12):
    n_layers = len(params)
    douts = [int(p['w'].shape[0]) for p in params]
    dins = [int(p['w'].shape[1]) for p in params]
    ctx_dim = int(params[0]['csw'].shape[1])
    assert dins[0] == dim and douts[-1] == dim * num_outlayers

    dout_pads = [_round_up(d, lane) for d in douts]           # lane-dense feature dims
    din_pads = [dins[0]] + dout_pads[:-1]                     # layer-0 K stays = dim

    # Fuse mask (+ row weight-norm on the output layer), transpose to (in, out), zero-pad.
    w_fused = []
    for i, p in enumerate(params):
        w = p['w'].astype(jnp.float32) * p['mask'].astype(jnp.float32)
        if i == n_layers - 1:                                 # hidden_to_output: norm=True
            norm = jnp.sqrt(jnp.sum(w * w, axis=1, keepdims=True))
            w = w / jnp.maximum(norm, eps)                    # eps guards all-zero masked rows
        w = jnp.pad(w.T, ((0, din_pads[i] - dins[i]), (0, dout_pads[i] - douts[i])))
        w_fused.append(w)                                     # f32 (in_pad, out_pad)

    # Stack every layer's context scale/bias projection into one matrix.
    # Column layout: [scale_0 | bias_0 | scale_1 | bias_1 | ...]; rows = [ctx | 1(bias)].
    blocks, sb_offsets, off = [], [], 0
    for i, p in enumerate(params):
        padc = dout_pads[i] - douts[i]
        s_cols = jnp.concatenate(
            [jnp.pad(p['csw'].T.astype(jnp.float32), ((0, 0), (0, padc))),
             jnp.pad(p['csb'].reshape(1, -1).astype(jnp.float32), ((0, 0), (0, padc)))],
            axis=0)
        b_cols = jnp.concatenate(
            [jnp.pad(p['cbw'].T.astype(jnp.float32), ((0, 0), (0, padc))),
             jnp.pad(p['cbb'].reshape(1, -1).astype(jnp.float32), ((0, 0), (0, padc)))],
            axis=0)
        blocks.append(jnp.concatenate([s_cols, b_cols], axis=1))
        sb_offsets.append(off)
        off += 2 * dout_pads[i]
    wc = jnp.concatenate(blocks, axis=1)                      # (ctx+1, total) f32
    total = off

    # Block-stack layer-0 weight with the context projections so ONE matmul against the
    # fused [x | ctx | 1] input produces [z0 | all scales & biases]:
    #   rows [0:dim]          = [ W0_fused | 0  ]
    #   rows [dim:dim+ctx+1]  = [ 0        | wc ]
    dp0 = dout_pads[0]
    top = jnp.concatenate([w_fused[0], jnp.zeros((dins[0], total), jnp.float32)], axis=1)
    bot = jnp.concatenate([jnp.zeros((ctx_dim + 1, dp0), jnp.float32), wc], axis=1)
    wcomb = jnp.concatenate([top, bot], axis=0).astype(compute_dtype)  # (dim+ctx+1, dp0+total)

    w_rest = tuple(w.astype(compute_dtype) for w in w_fused[1:])

    return dict(
        wcomb=wcomb, w_rest=w_rest,
        dim=dim, num_outlayers=num_outlayers, ctx_dim=ctx_dim,
        num_layers=n_layers, dout_pads=tuple(dout_pads), din_pads=tuple(din_pads),
        sb_offsets=tuple(sb_offsets), dp0=dp0, total=total,
        compute_dtype=compute_dtype,
    )


# --------------------------------------------------------------------------- #
# Tile-size / VMEM budgeting helpers.
# --------------------------------------------------------------------------- #
def _physical_vmem_bytes():
    try:
        return int(pltpu.get_tpu_info().vmem_capacity_bytes)
    except Exception:
        return 64 * 1024 * 1024            # conservative: v7x has 64 MiB per TensorCore


def _default_vmem_limit_bytes():
    # Generation-aware scoped-VMEM budget: ~51 MiB on v7x (64 MiB), ~102 MiB on v5e/v6e.
    return min(int(0.8 * _physical_vmem_bytes()), 112 * 1024 * 1024)


def _pick_batch_tile(B, batch_tile, k0, dout_last, dp0, total, max_dp,
                     resident_bytes, per_layer_sb, vmem_limit_bytes):
    B8 = _round_up(B, 8)
    TB = max(8, min(_round_up(batch_tile, 8), B8))
    # v7x megacore: give both TensorCores work when the batch allows >= 2 grid steps.
    if B8 >= 16 and (B8 + TB - 1) // TB < 2:
        TB = _round_up((B8 + 1) // 2, 8)
    # Rough per-row VMEM footprint: double-buffered streamed tiles + f32 intermediates.
    stream_per_row = 2 * (2 * k0 + 4 * dout_last)
    if per_layer_sb:
        scratch_per_row = 4 * (dp0 + 2 * max_dp) + 8 * max_dp
    else:
        scratch_per_row = 4 * (dp0 + total) + 8 * max_dp
    budget = int(0.6 * vmem_limit_bytes) - resident_bytes
    per_row = stream_per_row + scratch_per_row
    while TB > 8 and TB * per_row > budget:
        TB = max(8, _round_up(TB // 2, 8))
    return TB


# --------------------------------------------------------------------------- #
# Forward pass: pad, batch-tile, pallas_call.
# --------------------------------------------------------------------------- #
def cmade_apply(x, context, prep, *, batch_tile=1024, context_proj="auto",
                vmem_limit_bytes=None, single_buffer_weights=True):
    """Runs the fused cMADE forward. Returns (out (B, dim, num_outlayers), context)."""
    assert context_proj in ("auto", "fused", "per_layer")
    dim, num_outlayers = prep["dim"], prep["num_outlayers"]
    ctx_dim, n_layers = prep["ctx_dim"], prep["num_layers"]
    dout_pads, sb_offsets = prep["dout_pads"], prep["sb_offsets"]
    dp0, total = prep["dp0"], prep["total"]
    cdt = prep["compute_dtype"]
    wcomb, w_rest = prep["wcomb"], prep["w_rest"]
    out_dim = dim * num_outlayers

    B = x.shape[0]
    k0 = dim + ctx_dim + 1
    if vmem_limit_bytes is None:
        vmem_limit_bytes = _default_vmem_limit_bytes()

    resident_bytes = 2 * (wcomb.size * 2 + sum(w.size * 2 for w in w_rest))

    # Decide whether the fused (TB, total) f32 scale/bias block is cheap enough to hold live.
    tb_target = max(8, min(_round_up(batch_tile, 8), _round_up(B, 8)))
    if context_proj == "auto":
        per_layer_sb = tb_target * total * 4 > 4 * 1024 * 1024
    else:
        per_layer_sb = context_proj == "per_layer"

    TB = _pick_batch_tile(B, batch_tile, k0, dout_pads[-1], dp0, total,
                          max(dout_pads), resident_bytes, per_layer_sb,
                          vmem_limit_bytes)
    B_pad = _round_up(B, TB)
    grid = (B_pad // TB,)

    # Single streamed input: [x | context | 1] (ones column folds in cscale/cbias biases).
    xc = jnp.concatenate([x, context, jnp.ones((B, 1), x.dtype)], axis=1)
    xc = jnp.pad(xc, ((0, B_pad - B), (0, 0))).astype(cdt)

    kernel = _make_cmade_kernel(n_layers, dp0, sb_offsets, dout_pads,
                                fused_ctx_proj=not per_layer_sb)

    # Advisory cost hint for the XLA scheduler.
    flops = 2 * B_pad * k0 * (dp0 + total)
    for i in range(1, n_layers):
        flops += 2 * B_pad * prep["din_pads"][i] * dout_pads[i]
    bytes_in = xc.size * 2 + wcomb.size * 2 + sum(w.size * 2 for w in w_rest)
    bytes_out = 4 * B_pad * dout_pads[-1]
    cost = pl.CostEstimate(flops=int(flops),
                           transcendentals=int(B_pad * sum(dout_pads[:-1])),
                           bytes_accessed=int(bytes_in + bytes_out))

    def run(single_buffer):
        if single_buffer:
            def resident_spec(shape):
                # Constant-index weights are fetched once; single-buffer their VMEM.
                return pl.BlockSpec(shape, lambda i: (0, 0),
                                    pipeline_mode=pl.Buffered(1))
        else:
            def resident_spec(shape):
                return pl.BlockSpec(shape, lambda i: (0, 0))
        in_specs = ([pl.BlockSpec((TB, k0), lambda i: (i, 0)),      # streamed [x|ctx|1]
                     resident_spec(wcomb.shape)] +                  # [W0 | ctx-proj] resident
                    [resident_spec(w.shape) for w in w_rest])       # layer weights resident
        out_specs = pl.BlockSpec((TB, dout_pads[-1]), lambda i: (i, 0))
        return pl.pallas_call(
            kernel,
            grid=grid,
            in_specs=in_specs,
            out_specs=out_specs,
            out_shape=jax.ShapeDtypeStruct((B_pad, dout_pads[-1]), jnp.float32),
            compiler_params=pltpu.CompilerParams(
                dimension_semantics=("parallel",),      # grid steps shard across TCs (v7x)
                vmem_limit_bytes=int(vmem_limit_bytes)),
            cost_estimate=cost,
        )(xc, wcomb, *w_rest)

    if single_buffer_weights:
        try:
            out_p = run(True)
        except Exception:
            # pipeline_mode=pl.Buffered(1) not accepted by this JAX/Mosaic build:
            # fall back to the default double-buffered resident weights.
            out_p = run(False)
    else:
        out_p = run(False)

    out = out_p[:B, :out_dim].reshape(B, dim, num_outlayers)
    return out, context


def cmade_forward(x, context, params, dim, num_outlayers, **apply_kwargs):
    """Convenience one-shot API: preprocess (batch-independent) + apply."""
    prep = cmade_preprocess(params, dim, num_outlayers,
                            compute_dtype=apply_kwargs.pop("compute_dtype", jnp.bfloat16))
    return cmade_apply(x, context, prep, **apply_kwargs)


# --------------------------------------------------------------------------- #
# Deterministic synthetic parameter initialization (shapes from cMADE.__init__).
# --------------------------------------------------------------------------- #
def init_params(key, dim, hid_dim, context_dim, num_layers, num_outlayers, masks):
    layer_dims = []
    d_in = dim
    for _ in range(num_layers - 1):
        layer_dims.append((d_in, hid_dim))
        d_in = hid_dim
    layer_dims.append((hid_dim, dim * num_outlayers))

    params = []
    for i, (din, dout) in enumerate(layer_dims):
        key, k1, k2, k3 = jax.random.split(key, 4)
        params.append(dict(
            w=0.1 * jax.random.normal(k1, (dout, din), jnp.float32),
            mask=jnp.asarray(masks[i], jnp.float32),
            csw=0.1 * jax.random.normal(k2, (dout, context_dim), jnp.float32),
            csb=jnp.ones((1, dout), jnp.float32),
            cbw=0.1 * jax.random.normal(k3, (dout, context_dim), jnp.float32),
            cbb=jnp.zeros((1, dout), jnp.float32),
        ))
    return params


# --------------------------------------------------------------------------- #
# Pure-JAX reference mirroring the kernel's bf16-input / f32-accumulate math.
# --------------------------------------------------------------------------- #
def cmade_reference(x, c, params, compute_dtype=jnp.bfloat16, eps=1e-12):
    n = len(params)
    c_aug = jnp.concatenate([c, jnp.ones((c.shape[0], 1), c.dtype)],
                            axis=1).astype(compute_dtype)
    h = x.astype(compute_dtype)
    for i, p in enumerate(params):
        w = p['w'].astype(jnp.float32) * p['mask'].astype(jnp.float32)
        if i == n - 1:
            w = w / jnp.maximum(jnp.sqrt(jnp.sum(w * w, axis=1, keepdims=True)), eps)
        w = w.T.astype(compute_dtype)
        sw = jnp.concatenate([p['csw'].T, p['csb'].reshape(1, -1)],
                             axis=0).astype(compute_dtype)
        bw = jnp.concatenate([p['cbw'].T, p['cbb'].reshape(1, -1)],
                             axis=0).astype(compute_dtype)
        scale = jnp.dot(c_aug, sw, preferred_element_type=jnp.float32)
        bias = jnp.dot(c_aug, bw, preferred_element_type=jnp.float32)
        a = scale * jnp.dot(h, w, preferred_element_type=jnp.float32) + bias
        if i < n - 1:
            a = jnp.where(a > 0.0, a, jnp.exp(jnp.minimum(a, 0.0)) - 1.0)
            h = a.astype(compute_dtype)
        else:
            h = a
    return h


if __name__ == "__main__":
    np.random.seed(0)                       # deterministic MADE masks

    dim, hid_dim, context_dim = 8, 32, 4
    num_layers, num_outlayers = 3, 2
    B = 8

    masks, rx = get_masks(dim, hid_dim, num_layers, num_outlayers,
                          fixed_order=False, derank=1)

    key = jax.random.PRNGKey(0)
    kx, kc, kp = jax.random.split(key, 3)
    x = jax.random.normal(kx, (B, dim), jnp.float32)
    context = jax.random.normal(kc, (B, context_dim), jnp.float32)
    params = init_params(kp, dim, hid_dim, context_dim,
                         num_layers, num_outlayers, masks)

    ref = cmade_reference(x, context, params).reshape(B, dim, num_outlayers)

    # Inference-style use: preprocess the weights ONCE, reuse across calls.
    prep = cmade_preprocess(params, dim, num_outlayers)

    # Exercise both context-projection code paths (fused and per-layer scale/bias).
    for mode in ("fused", "per_layer"):
        out, ctx_out = cmade_apply(x, context, prep, context_proj=mode)
        out = jax.block_until_ready(out)
        assert out.shape == (B, dim, num_outlayers)
        np.testing.assert_allclose(np.asarray(out), np.asarray(ref),
                                   rtol=2e-3, atol=2e-3)
        np.testing.assert_array_equal(np.asarray(ctx_out), np.asarray(context))

    # Convenience one-shot API.
    out2, _ = cmade_forward(x, context, params, dim, num_outlayers)
    out2 = jax.block_until_ready(out2)
    np.testing.assert_allclose(np.asarray(out2), np.asarray(ref),
                               rtol=2e-3, atol=2e-3)

    print("KERNEL_OK")
</pallas_src>

<mosaic_0001>
module attributes {stable_mosaic.version = 11 : i64} {
  func.func @kernel(%arg0: i32, %arg1: memref<8x13xbf16, #tpu.memory_space<vmem>>, %arg2: memref<13x896xbf16, #tpu.memory_space<vmem>>, %arg3: memref<128x128xbf16, #tpu.memory_space<vmem>>, %arg4: memref<128x128xbf16, #tpu.memory_space<vmem>>, %arg5: memref<8x128xf32, #tpu.memory_space<vmem>>) attributes {dimension_semantics = [#tpu.dimension_semantics<parallel>], iteration_bounds = array<i64: 1>, scalar_prefetch = 0 : i64, scratch_operands = 0 : i64, tpu.core_type = #tpu.core_type<tc>, window_params = [{transform_indices = @transform_0, window_bounds = array<i64: 8, 13>}, {pipeline_mode = #tpu.pipeline_mode<synchronous>, transform_indices = @transform_1, window_bounds = array<i64: 13, 896>}, {pipeline_mode = #tpu.pipeline_mode<synchronous>, transform_indices = @transform_2, window_bounds = array<i64: 128, 128>}, {pipeline_mode = #tpu.pipeline_mode<synchronous>, transform_indices = @transform_3, window_bounds = array<i64: 128, 128>}, {transform_indices = @transform_4, window_bounds = array<i64: 8, 128>}]} {
    %c0 = arith.constant 0 : index
    %c0_0 = arith.constant 0 : index
    %0 = vector.load %arg1[%c0, %c0_0] : memref<8x13xbf16, #tpu.memory_space<vmem>>, vector<8x13xbf16>
    %c0_1 = arith.constant 0 : index
    %c0_2 = arith.constant 0 : index
    %1 = vector.load %arg2[%c0_1, %c0_2] : memref<13x896xbf16, #tpu.memory_space<vmem>>, vector<13x896xbf16>
    %cst = arith.constant dense<0.000000e+00> : vector<8x896xf32>
    %2 = tpu.matmul %0, %1, %cst {dimension_numbers = #tpu.dot_dimension_numbers<[1], [0], [0], [1], [0, 0, 1, 1], [], []>} : vector<8x13xbf16>, vector<13x896xbf16>, vector<8x896xf32> -> vector<8x896xf32>
    %3 = vector.extract_strided_slice %2 {offsets = [0, 0], sizes = [8, 128], strides = [1, 1]} : vector<8x896xf32> to vector<8x128xf32>
    %4 = vector.extract_strided_slice %2 {offsets = [0, 128], sizes = [8, 128], strides = [1, 1]} : vector<8x896xf32> to vector<8x128xf32>
    %5 = vector.extract_strided_slice %2 {offsets = [0, 256], sizes = [8, 128], strides = [1, 1]} : vector<8x896xf32> to vector<8x128xf32>
    %6 = arith.mulf %4, %3 : vector<8x128xf32>
    %7 = arith.addf %6, %5 : vector<8x128xf32>
    %cst_3 = arith.constant 0.000000e+00 : f32
    %8 = vector.broadcast %cst_3 : f32 to vector<8x128xf32>
    %9 = arith.cmpf ogt, %7, %8 : vector<8x128xf32>
    %cst_4 = arith.constant 0.000000e+00 : f32
    %10 = vector.broadcast %cst_4 : f32 to vector<8x128xf32>
    %11 = arith.minimumf %7, %10 : vector<8x128xf32>
    %12 = math.exp %11 : vector<8x128xf32>
    %cst_5 = arith.constant 1.000000e+00 : f32
    %13 = vector.broadcast %cst_5 : f32 to vector<8x128xf32>
    %14 = arith.subf %12, %13 : vector<8x128xf32>
    %15 = arith.select %9, %7, %14 : vector<8x128xi1>, vector<8x128xf32>
    %16 = arith.truncf %15 : vector<8x128xf32> to vector<8x128xbf16>
    %c0_6 = arith.constant 0 : index
    %c0_7 = arith.constant 0 : index
    %17 = vector.load %arg3[%c0_6, %c0_7] : memref<128x128xbf16, #tpu.memory_space<vmem>>, vector<128x128xbf16>
    %cst_8 = arith.constant dense<0.000000e+00> : vector<8x128xf32>
    %18 = tpu.matmul %16, %17, %cst_8 {dimension_numbers = #tpu.dot_dimension_numbers<[1], [0], [0], [1], [0, 0, 1, 1], [], []>} : vector<8x128xbf16>, vector<128x128xbf16>, vector<8x128xf32> -> vector<8x128xf32>
    %19 = vector.extract_strided_slice %2 {offsets = [0, 384], sizes = [8, 128], strides = [1, 1]} : vector<8x896xf32> to vector<8x128xf32>
    %20 = vector.extract_strided_slice %2 {offsets = [0, 512], sizes = [8, 128], strides = [1, 1]} : vector<8x896xf32> to vector<8x128xf32>
    %21 = arith.mulf %19, %18 : vector<8x128xf32>
    %22 = arith.addf %21, %20 : vector<8x128xf32>
    %cst_9 = arith.constant 0.000000e+00 : f32
    %23 = vector.broadcast %cst_9 : f32 to vector<8x128xf32>
    %24 = arith.cmpf ogt, %22, %23 : vector<8x128xf32>
    %cst_10 = arith.constant 0.000000e+00 : f32
    %25 = vector.broadcast %cst_10 : f32 to vector<8x128xf32>
    %26 = arith.minimumf %22, %25 : vector<8x128xf32>
    %27 = math.exp %26 : vector<8x128xf32>
    %cst_11 = arith.constant 1.000000e+00 : f32
    %28 = vector.broadcast %cst_11 : f32 to vector<8x128xf32>
    %29 = arith.subf %27, %28 : vector<8x128xf32>
    %30 = arith.select %24, %22, %29 : vector<8x128xi1>, vector<8x128xf32>
    %31 = arith.truncf %30 : vector<8x128xf32> to vector<8x128xbf16>
    %c0_12 = arith.constant 0 : index
    %c0_13 = arith.constant 0 : index
    %32 = vector.load %arg4[%c0_12, %c0_13] : memref<128x128xbf16, #tpu.memory_space<vmem>>, vector<128x128xbf16>
    %cst_14 = arith.constant dense<0.000000e+00> : vector<8x128xf32>
    %33 = tpu.matmul %31, %32, %cst_14 {dimension_numbers = #tpu.dot_dimension_numbers<[1], [0], [0], [1], [0, 0, 1, 1], [], []>} : vector<8x128xbf16>, vector<128x128xbf16>, vector<8x128xf32> -> vector<8x128xf32>
    %34 = vector.extract_strided_slice %2 {offsets = [0, 640], sizes = [8, 128], strides = [1, 1]} : vector<8x896xf32> to vector<8x128xf32>
    %35 = vector.extract_strided_slice %2 {offsets = [0, 768], sizes = [8, 128], strides = [1, 1]} : vector<8x896xf32> to vector<8x128xf32>
    %36 = arith.mulf %34, %33 : vector<8x128xf32>
    %37 = arith.addf %36, %35 : vector<8x128xf32>
    %c0_15 = arith.constant 0 : index
    %c0_16 = arith.constant 0 : index
    %38 = vector.load %arg5[%c0_15, %c0_16] : memref<8x128xf32, #tpu.memory_space<vmem>>, vector<8x128xf32>
    tpu.vector_store %arg5[%c0_15, %c0_16], %37 {strides = array<i32>} : memref<8x128xf32, #tpu.memory_space<vmem>>, vector<8x128xf32>,
    return
  }
  func.func @transform_0(%arg0: i32) -> (i32, i32) {
    %c0_i32 = arith.constant 0 : i32
    %c0_i32_0 = arith.constant 0 : i32
    return %arg0, %c0_i32 : i32, i32
  }
  func.func @transform_1(%arg0: i32) -> (i32, i32) {
    %c0_i32 = arith.constant 0 : i32
    %c0_i32_0 = arith.constant 0 : i32
    %c0_i32_1 = arith.constant 0 : i32
    return %c0_i32, %c0_i32_0 : i32, i32
  }
  func.func @transform_2(%arg0: i32) -> (i32, i32) {
    %c0_i32 = arith.constant 0 : i32
    %c0_i32_0 = arith.constant 0 : i32
    %c0_i32_1 = arith.constant 0 : i32
    return %c0_i32, %c0_i32_0 : i32, i32
  }
  func.func @transform_3(%arg0: i32) -> (i32, i32) {
    %c0_i32 = arith.constant 0 : i32
    %c0_i32_0 = arith.constant 0 : i32
    %c0_i32_1 = arith.constant 0 : i32
    return %c0_i32, %c0_i32_0 : i32, i32
  }
  func.func @transform_4(%arg0: i32) -> (i32, i32) {
    %c0_i32 = arith.constant 0 : i32
    %c0_i32_0 = arith.constant 0 : i32
    return %arg0, %c0_i32 : i32, i32
  }
}

module attributes {stable_mosaic.version = 11 : i64} {
  func.func @kernel(%arg0: i32, %arg1: memref<8x13xbf16, #tpu.memory_space<vmem>>, %arg2: memref<13x896xbf16, #tpu.memory_space<vmem>>, %arg3: memref<128x128xbf16, #tpu.memory_space<vmem>>, %arg4: memref<128x128xbf16, #tpu.memory_space<vmem>>, %arg5: memref<8x128xf32, #tpu.memory_space<vmem>>) attributes {dimension_semantics = [#tpu.dimension_semantics<parallel>], iteration_bounds = array<i64: 1>, scalar_prefetch = 0 : i64, scratch_operands = 0 : i64, tpu.core_type = #tpu.core_type<tc>, window_params = [{transform_indices = @transform_0, window_bounds = array<i64: 8, 13>}, {pipeline_mode = #tpu.pipeline_mode<synchronous>, transform_indices = @transform_1, window_bounds = array<i64: 13, 896>}, {pipeline_mode = #tpu.pipeline_mode<synchronous>, transform_indices = @transform_2, window_bounds = array<i64: 128, 128>}, {pipeline_mode = #tpu.pipeline_mode<synchronous>, transform_indices = @transform_3, window_bounds = array<i64: 128, 128>}, {transform_indices = @transform_4, window_bounds = array<i64: 8, 128>}]} {
    %c0 = arith.constant 0 : index
    %c0_0 = arith.constant 0 : index
    %0 = vector.load %arg1[%c0, %c0_0] : memref<8x13xbf16, #tpu.memory_space<vmem>>, vector<8x13xbf16>
    %c0_1 = arith.constant 0 : index
    %c0_2 = arith.constant 0 : index
    %1 = vector.load %arg2[%c0_1, %c0_2] : memref<13x896xbf16, #tpu.memory_space<vmem>>, vector<13x896xbf16>
    %cst = arith.constant dense<0.000000e+00> : vector<8x896xf32>
    %2 = tpu.matmul %0, %1, %cst {dimension_numbers = #tpu.dot_dimension_numbers<[1], [0], [0], [1], [0, 0, 1, 1], [], []>} : vector<8x13xbf16>, vector<13x896xbf16>, vector<8x896xf32> -> vector<8x896xf32>
    %3 = vector.extract_strided_slice %2 {offsets = [0, 0], sizes = [8, 128], strides = [1, 1]} : vector<8x896xf32> to vector<8x128xf32>
    %4 = vector.extract_strided_slice %2 {offsets = [0, 128], sizes = [8, 128], strides = [1, 1]} : vector<8x896xf32> to vector<8x128xf32>
    %5 = vector.extract_strided_slice %2 {offsets = [0, 256], sizes = [8, 128], strides = [1, 1]} : vector<8x896xf32> to vector<8x128xf32>
    %6 = arith.mulf %4, %3 : vector<8x128xf32>
    %7 = arith.addf %6, %5 : vector<8x128xf32>
    %cst_3 = arith.constant 0.000000e+00 : f32
    %8 = vector.broadcast %cst_3 : f32 to vector<8x128xf32>
    %9 = arith.cmpf ogt, %7, %8 : vector<8x128xf32>
    %cst_4 = arith.constant 0.000000e+00 : f32
    %10 = vector.broadcast %cst_4 : f32 to vector<8x128xf32>
    %11 = arith.minimumf %7, %10 : vector<8x128xf32>
    %12 = math.exp %11 : vector<8x128xf32>
    %cst_5 = arith.constant 1.000000e+00 : f32
    %13 = vector.broadcast %cst_5 : f32 to vector<8x128xf32>
    %14 = arith.subf %12, %13 : vector<8x128xf32>
    %15 = arith.select %9, %7, %14 : vector<8x128xi1>, vector<8x128xf32>
    %16 = arith.truncf %15 : vector<8x128xf32> to vector<8x128xbf16>
    %c0_6 = arith.constant 0 : index
    %c0_7 = arith.constant 0 : index
    %17 = vector.load %arg3[%c0_6, %c0_7] : memref<128x128xbf16, #tpu.memory_space<vmem>>, vector<128x128xbf16>
    %cst_8 = arith.constant dense<0.000000e+00> : vector<8x128xf32>
    %18 = tpu.matmul %16, %17, %cst_8 {dimension_numbers = #tpu.dot_dimension_numbers<[1], [0], [0], [1], [0, 0, 1, 1], [], []>} : vector<8x128xbf16>, vector<128x128xbf16>, vector<8x128xf32> -> vector<8x128xf32>
    %19 = vector.extract_strided_slice %2 {offsets = [0, 384], sizes = [8, 128], strides = [1, 1]} : vector<8x896xf32> to vector<8x128xf32>
    %20 = vector.extract_strided_slice %2 {offsets = [0, 512], sizes = [8, 128], strides = [1, 1]} : vector<8x896xf32> to vector<8x128xf32>
    %21 = arith.mulf %19, %18 : vector<8x128xf32>
    %22 = arith.addf %21, %20 : vector<8x128xf32>
    %cst_9 = arith.constant 0.000000e+00 : f32
    %23 = vector.broadcast %cst_9 : f32 to vector<8x128xf32>
    %24 = arith.cmpf ogt, %22, %23 : vector<8x128xf32>
    %cst_10 = arith.constant 0.000000e+00 : f32
    %25 = vector.broadcast %cst_10 : f32 to vector<8x128xf32>
    %26 = arith.minimumf %22, %25 : vector<8x128xf32>
    %27 = math.exp %26 : vector<8x128xf32>
    %cst_11 = arith.constant 1.000000e+00 : f32
    %28 = vector.broadcast %cst_11 : f32 to vector<8x128xf32>
    %29 = arith.subf %27, %28 : vector<8x128xf32>
    %30 = arith.select %24, %22, %29 : vector<8x128xi1>, vector<8x128xf32>
    %31 = arith.truncf %30 : vector<8x128xf32> to vector<8x128xbf16>
    %c0_12 = arith.constant 0 : index
    %c0_13 = arith.constant 0 : index
    %32 = vector.load %arg4[%c0_12, %c0_13] : memref<128x128xbf16, #tpu.memory_space<vmem>>, vector<128x128xbf16>
    %cst_14 = arith.constant dense<0.000000e+00> : vector<8x128xf32>
    %33 = tpu.matmul %31, %32, %cst_14 {dimension_numbers = #tpu.dot_dimension_numbers<[1], [0], [0], [1], [0, 0, 1, 1], [], []>} : vector<8x128xbf16>, vector<128x128xbf16>, vector<8x128xf32> -> vector<8x128xf32>
    %34 = vector.extract_strided_slice %2 {offsets = [0, 640], sizes = [8, 128], strides = [1, 1]} : vector<8x896xf32> to vector<8x128xf32>
    %35 = vector.extract_strided_slice %2 {offsets = [0, 768], sizes = [8, 128], strides = [1, 1]} : vector<8x896xf32> to vector<8x128xf32>
    %36 = arith.mulf %34, %33 : vector<8x128xf32>
    %37 = arith.addf %36, %35 : vector<8x128xf32>
    %c0_15 = arith.constant 0 : index
    %c0_16 = arith.constant 0 : index
    %38 = vector.load %arg5[%c0_15, %c0_16] : memref<8x128xf32, #tpu.memory_space<vmem>>, vector<8x128xf32>
    tpu.vector_store %arg5[%c0_15, %c0_16], %37 {strides = array<i32>} : memref<8x128xf32, #tpu.memory_space<vmem>>, vector<8x128xf32>,
    return
  }
  func.func @transform_0(%arg0: i32) -> (i32, i32) {
    %c0_i32 = arith.constant 0 : i32
    %c0_i32_0 = arith.constant 0 : i32
    return %arg0, %c0_i32 : i32, i32
  }
  func.func @transform_1(%arg0: i32) -> (i32, i32) {
    %c0_i32 = arith.constant 0 : i32
    %c0_i32_0 = arith.constant 0 : i32
    %c0_i32_1 = arith.constant 0 : i32
    return %c0_i32, %c0_i32_0 : i32, i32
  }
  func.func @transform_2(%arg0: i32) -> (i32, i32) {
    %c0_i32 = arith.constant 0 : i32
    %c0_i32_0 = arith.constant 0 : i32
    %c0_i32_1 = arith.constant 0 : i32
    return %c0_i32, %c0_i32_0 : i32, i32
  }
  func.func @transform_3(%arg0: i32) -> (i32, i32) {
    %c0_i32 = arith.constant 0 : i32
    %c0_i32_0 = arith.constant 0 : i32
    %c0_i32_1 = arith.constant 0 : i32
    return %c0_i32, %c0_i32_0 : i32, i32
  }
  func.func @transform_4(%arg0: i32) -> (i32, i32) {
    %c0_i32 = arith.constant 0 : i32
    %c0_i32_0 = arith.constant 0 : i32
    return %arg0, %c0_i32 : i32, i32
  }
}

</mosaic_0001>

<bundles_post_ra>
// kernel: tpu_custom_call.1
= control target key start
LH: loop header
LB: loop body
LE: loop exit
PB: predicated region body
PF: predicated region fallthrough
CT: control target
= control target key end

     0   :  { %9 = vsyncpa [#allocation3], 0  ;;  %s773_s0 = inlined_call_operand.hbm [shape: bf16[8,13], index: 0, kind: input, shape index: {}]   ;;  %s774_s1 = inlined_call_operand.hbm [shape: bf16[13,896], index: 1, kind: input, shape index: {}]   ;;  %s775_s2 = inlined_call_operand.hbm [shape: bf16[128,128], index: 2, kind: input, shape index: {}]   ;;  %s776_s3 = inlined_call_operand.hbm [shape: bf16[128,128], index: 3, kind: input, shape index: {}]   ;;  %s777_s4 = inlined_call_operand.hbm [shape: f32[8,128], index: 4, kind: output, shape index: {}]  }
   0x1   :  { %10 = vsyncpa [#allocation6], 0 }
   0x2   :  { %11 = vsyncpa [#allocation9], 0  ;;  %s28_s17 = sshll.u32 %s774_s1, 4  ;;  %s29_s17 = int_to_ptr.hbm [resolvable:$true] %s28_s17 }
   0x3   :  { %12 = vsyncpa [#allocation4], 0  ;;  %s698_s18 = smov [#allocation5]   ;;  %s18_s22 = sshll.u32 %s773_s0, 4  ;;  %s19_s22 = int_to_ptr.hbm [resolvable:$true] %s18_s22 }
   0x4   :  { %s30_s19 = sshll.u32 %s698_s18, 4  ;;  %s699_s23 = smov 448   ;;  %s31_s19 = int_to_ptr.vmem [resolvable:$true] %s30_s19 }
   0x5   :  { %s700_s24 = smov 28   ;;  %s701_s25 = smov [#allocation2]  }
   0x6   :  { %36 = dma.hbm_to_vmem [thread:$0]  %s29_s17, 896, %s31_s19, [#allocation6], %s699_s23, %s699_s23, %s700_s24  }
   0x7   :  { %s20_s26 = sshll.u32 %s701_s25, 4  ;;  %s41_s29 = sshll.u32 %s775_s2, 4  ;;  %s21_s26 = int_to_ptr.vmem [resolvable:$true] %s20_s26  ;;  %s42_s29 = int_to_ptr.hbm [resolvable:$true] %s41_s29 }
   0x8   :  { %23 = dma.hbm_to_vmem [thread:$0]  %s19_s22, 64, %s21_s26, [#allocation3]  }
   0x9   :  { %s702_s1 = smov [#allocation7]   ;;  %s54_s0 = sshll.u32 %s776_s3, 4  ;;  %s55_s0 = int_to_ptr.hbm [resolvable:$true] %s54_s0 }
   0xa   :  { %s43_s30 = sshll.u32 %s702_s1, 4  ;;  %s703_s7 = smov 64   ;;  %s44_s30 = int_to_ptr.vmem [resolvable:$true] %s43_s30 }
   0xb   :  { %s704_s8 = smov 4   ;;  %s705_s9 = smov [#allocation8]  }
   0xc   :  { %49 = dma.hbm_to_vmem [thread:$0]  %s42_s29, 1024, %s44_s30, [#allocation6], %s703_s7, %s703_s7, %s704_s8  }
   0xd   :  { %s56_s10 = sshll.u32 %s705_s9, 4  ;;  %s57_s10 = int_to_ptr.vmem [resolvable:$true] %s56_s10 }
   0xe   :  { %62 = dma.hbm_to_vmem [thread:$0]  %s55_s0, 1024, %s57_s10, [#allocation9], %s703_s7, %s703_s7, %s704_s8  }
   0xf   :  { %690 = dma.done.wait [#allocation3], 64  }
  0x10   :  { %691 = vsyncadd [#allocation3], 4294967232 }
  0x11   :  { %692 = dma.done.wait [#allocation6], 1920  }
  0x12   :  { %693 = vsyncadd [#allocation6], 4294965376 }
  0x13   :  { %694 = dma.done.wait [#allocation9], 1024  }
  0x14   :  { %695 = vsyncadd [#allocation9], 4294966272  ;;  %vm122_vm0 = vcmask 1045504   ;;  %vm123_vm1 = vcmask 1046528   ;;  %v706_v0 = vmov 65535   ;;  %vm118_vm2 = vcmask 105472  }
  0x15   :  { %v124_v1 = vsel %vm122_vm0, 4294967295, %v706_v0  ;;  %v434_v2 = vld [vmem:[#allocation5] sm:$0xf]  ;;  %v536_v3 = vld [vmem:[#allocation5 + $0x18] sm:$0x70]  ;;  %v547_v19 = vld [vmem:[#allocation7 + $0x38] sm:$0xff] }
  0x16   :  { %v745_v4 = vsel %vm123_vm1, %v124_v1, 0  ;;  %v435_v5 = vor.u32 %v536_v3, %v434_v2  ;;  %v533_v6 = vld [vmem:[#allocation5 + $0x4] sm:$0xf]  ;;  %v436_v7 = vld [vmem:[#allocation5 + $0x1c] sm:$0x70]  ;;  %v546_v21 = vld [vmem:[#allocation7 + $0x30] sm:$0xff] }
  0x17   :  { %v442_v8 = vld [vmem:[#allocation5 + $0x8] sm:$0xf]  ;;  %v439_v9 = vor.u32 %v533_v6, %v436_v7  ;;  %v537_v10 = vld [vmem:[#allocation5 + $0x20] sm:$0x70]  ;;  %v749_v14 = vld [vmem:[#allocation2] sm:$0xf] }
  0x18   :  { %v127_v11 = vand.u32 %v435_v5, %v745_v4  ;;  %v443_v12 = vor.u32 %v537_v10, %v442_v8  ;;  %v534_v16 = vld [vmem:[#allocation5 + $0xc] sm:$0xf]  ;;  %v444_v17 = vld [vmem:[#allocation5 + $0x24] sm:$0x70]  ;;  %v545_v22 = vld [vmem:[#allocation7 + $0x28] sm:$0xff]  ;;  %s707_s2 = smov [#allocation10]  }
  0x19   :  { %v130_v13 = vand.u32 %v439_v9, %v745_v4  ;;  %v447_v18 = vor.u32 %v534_v16, %v444_v17  ;;  %v544_v23 = vld [vmem:[#allocation7 + $0x20] sm:$0xff]  ;;  %v543_v24 = vld [vmem:[#allocation7 + $0x18] sm:$0xff]  ;;  %v542_v25 = vld [vmem:[#allocation7 + $0x10] sm:$0xff]  ;;  %s418_s3 = sshll.u32 %s707_s2, 4  ;;  %s420_s13 = sshll.u32 %s777_s4, 4  ;;  %s419_s3 = int_to_ptr.vmem [resolvable:$true] %s418_s3  ;;  %s421_s13 = int_to_ptr.hbm [resolvable:$true] %s420_s13 }
  0x1a   :  { %154 = vmatpush.bf16.msra.mxu1 %v127_v11  ;;  %v133_v15 = vand.u32 %v443_v12, %v745_v4  ;;  %v450_v26 = vld [vmem:[#allocation5 + $0x10] sm:$0xf]  ;;  %v538_v27 = vld [vmem:[#allocation5 + $0x28] sm:$0x70]  ;;  %v541_v28 = vld [vmem:[#allocation7 + $0x8] sm:$0xff] }
  0x1b   :  { %v136_v20 = vand.u32 %v447_v18, %v745_v4  ;;  %v451_v29 = vor.u32 %v538_v27, %v450_v26  ;;  %v540_v31 = vld [vmem:[#allocation7] sm:$0xff]  ;;  %v555_v46 = vld [vmem:[#allocation8 + $0x38] sm:$0xff]  ;;  %v554_v47 = vld [vmem:[#allocation8 + $0x30] sm:$0xff] }
  0x1c   :  { %180 = vmatpush.bf16.msra.mxu2 %v133_v15  ;;  %v458_v48 = vld [vmem:[#allocation5 + $0x18] sm:$0xf]  ;;  %v539_v49 = vld [vmem:[#allocation5 + $0x30] sm:$0x70]  ;;  %v553_v50 = vld [vmem:[#allocation8 + $0x28] sm:$0xff] }
  0x1d   :  { %460 = vmatmul.msk.bf16.vlgmr.msra.gmra.mxu1 %vm118_vm2, %v749_v14  ;;  %193 = vmatpush.bf16.msra.mxu3 %v136_v20  ;;  %v139_v30 = vand.u32 %v451_v29, %v745_v4  ;;  %v459_v51 = vor.u32 %v539_v49, %v458_v48  ;;  %v552_v57 = vld [vmem:[#allocation8 + $0x20] sm:$0xff]  ;;  %v551_v58 = vld [vmem:[#allocation8 + $0x18] sm:$0xff]  ;;  %v550_v63 = vld [vmem:[#allocation8 + $0x10] sm:$0xff] }
  0x1e   :  { %167 = vmatpush.bf16.msrb.mxu1 %v130_v13  ;;  %v535_v59 = vld [vmem:[#allocation5 + $0x14] sm:$0xf]  ;;  %v452_v60 = vld [vmem:[#allocation5 + $0x2c] sm:$0x70]  ;;  %v549_v0 = vld [vmem:[#allocation8 + $0x8] sm:$0xff] }
  0x1f   :  { %462 = vmatmul.msk.bf16.vlgmr.msra.gmra.mxu2 %vm118_vm2, %v749_v14  ;;  %206 = vmatpush.bf16.msra.mxu0 %v139_v30  ;;  %v145_v52 = vand.u32 %v459_v51, %v745_v4  ;;  %v455_v61 = vor.u32 %v535_v59, %v452_v60  ;;  %v548_v1 = vld [vmem:[#allocation8] sm:$0xff] }
  0x20   :  { %463 = vmatmul.msk.bf16.vlgmr.msra.gmra.mxu3 %vm118_vm2, %v749_v14 }
  0x21   :  { %311 = vmatpush.bf16.msrb.mxu3 %v547_v19  ;;  %232 = vmatpush.bf16.msrb.mxu2 %v145_v52  ;;  %v142_v62 = vand.u32 %v455_v61, %v745_v4 }
  0x22   :  { %464 = vmatmul.msk.bf16.vlgmr.msra.gmra.mxu0 %vm118_vm2, %v749_v14 }
  0x23   :  { %397 = vmatpush.bf16.msrb.mxu0 %v555_v46  ;;  %219 = vmatpush.bf16.msra.mxu1 %v142_v62 }
  0x25   :  { %312 = vmatpush.bf16.msrb.mxu3 %v546_v21 }
  0x27   :  { %398 = vmatpush.bf16.msrb.mxu0 %v554_v47 }
  0x29   :  { %313 = vmatpush.bf16.msrb.mxu3 %v545_v22 }
  0x2b   :  { %399 = vmatpush.bf16.msrb.mxu0 %v553_v50 }
  0x2d   :  { %461 = vmatmul.msk.bf16.vlgmr.msrb.gmra.mxu1 %vm118_vm2, %v749_v14  ;;  %314 = vmatpush.bf16.msrb.mxu3 %v544_v23 }
  0x2f   :  { %466 = vmatmul.msk.bf16.vlgmr.msrb.gmra.mxu2 %vm118_vm2, %v749_v14  ;;  %400 = vmatpush.bf16.msrb.mxu0 %v552_v57 }
  0x31   :  { %315 = vmatpush.bf16.msrb.mxu3 %v543_v24 }
  0x33   :  { %401 = vmatpush.bf16.msrb.mxu0 %v551_v58 }
  0x35   :  { %316 = vmatpush.bf16.msrb.mxu3 %v542_v25 }
  0x37   :  { %402 = vmatpush.bf16.msrb.mxu0 %v550_v63 }
  0x39   :  { %317 = vmatpush.bf16.msrb.mxu3 %v541_v28 }
  0x3b   :  { %403 = vmatpush.bf16.msrb.mxu0 %v549_v0 }
  0x3d   :  { %318 = vmatpush.bf16.msrb.mxu3 %v540_v31  ;;  %465 = vmatmul.msk.bf16.vlgmr.msra.gmra.mxu1 %vm118_vm2, %v749_v14 }
  0x3f   :  { %404 = vmatpush.bf16.msrb.mxu0 %v548_v1 }
  0x9a   :  { %v156_v32 = vpop.f32.mrf.mxu1 }
  0x9f   :  { %v208_v55 = vpop.f32.mrf.mxu0 }
  0xa2   :  { %v158_v33 = vpop.f32.mrf.mxu1  ;;  %v182_v34 = vpop.f32.mrf.mxu2 }
  0xa3   :  { %v195_v53 = vpop.f32.mrf.mxu3 }
  0xa7   :  { %v210_v56 = vpop.f32.mrf.mxu0 }
  0xaa   :  { %v169_v35 = vpop.f32.mrf.mxu1  ;;  %v184_v36 = vpop.f32.mrf.mxu2 }
  0xab   :  { %v238_v37 = vmul.f32 %v169_v35, %v156_v32  ;;  %v197_v54 = vpop.f32.mrf.mxu3 }
  0xad   :  { %v239_v38 = vadd.f32 %v238_v37, %v182_v34 }
  0xaf   :  { %v241_v39 = vmin.f32 %v239_v38, 0.0  ;;  %vm240_vm3 = vcmp.gt.f32.partialorder %v239_v38, 0.0 }
  0xb1   :  { %v242_v40 = vmul.f32 1.442695, %v241_v39 }
  0xb2   :  { %v171_v41 = vpop.f32.mrf.mxu1  ;;  %v234_v12 = vpop.f32.mrf.mxu2 }
  0xb3   :  { %566 = vpow2.f32 %v242_v40 }
  0xb9   :  { %v567_v42 = vpop.eup %566 }
  0xba   :  { %v467_v43 = vadd.f32 -1.0, %v567_v42  ;;  %v236_v13 = vpop.f32.mrf.mxu2  ;;  %v221_v15 = vpop.f32.mrf.mxu1 }
  0xbc   :  { %v245_v44 = vsel %vm240_vm3, %v239_v38, %v467_v43 }
  0xbd   :  { %v246_v45 = vpack.c.bf16 %v245_v44, %v245_v44 }
  0xbf   :  { %319 = vmatmul.bf16.vlgmr.msrb.gmra.mxu3 %v246_v45 }
  0xc2   :  { %v223_v14 = vpop.f32.mrf.mxu1 }
 0x142   :  { %v320_v2 = vpop.f32.mrf.mxu3 }
 0x143   :  { %v324_v3 = vmul.f32 %v320_v2, %v195_v53 }
 0x145   :  { %v325_v5 = vadd.f32 %v324_v3, %v208_v55 }
 0x147   :  { %v327_v6 = vmin.f32 %v325_v5, 0.0  ;;  %vm326_vm4 = vcmp.gt.f32.partialorder %v325_v5, 0.0 }
 0x149   :  { %v328_v7 = vmul.f32 1.442695, %v327_v6 }
 0x14a   :  { %v322_v8 = vpop.f32.mrf.mxu3 }
 0x14b   :  { %568 = vpow2.f32 %v328_v7 }
 0x151   :  { %v569_v9 = vpop.eup %568 }
 0x152   :  { %v500_v10 = vadd.f32 -1.0, %v569_v9 }
 0x154   :  { %v331_v4 = vsel %vm326_vm4, %v325_v5, %v500_v10 }
 0x155   :  { %v332_v11 = vpack.c.bf16 %v331_v4, %v331_v4 }
 0x157   :  { %405 = vmatmul.bf16.vlgmr.msrb.gmra.mxu0 %v332_v11 }
 0x1d4   :  { %v406_v16 = vpop.f32.mrf.mxu0 }
 0x1d5   :  { %v410_v17 = vmul.f32 %v406_v16, %v221_v15 }
 0x1d7   :  { %v411_v18 = vadd.f32 %v410_v17, %v234_v12 }
 0x1d9   :  { %412 = vst [vmem:[#allocation10] sm:$0xff] %v411_v18 }
 0x1da   :  { %423 = dma.vmem_to_hbm [thread:$0]  %s419_s3, 128, %s421_s13, [#allocation4]  }
 0x1dc   :  { %v408_v19 = vpop.f32.mrf.mxu0 }
 0x1dd   :  { %696 = dma.done.wait [#allocation4], 128  }
 0x1de   :  { %697 = vsyncadd [#allocation4], 4294967168 }
 0x1df   :  { %428 = vsyncpa [#allocation3], 1 }
 0x1e0   :  { %429 = vsyncpa [#allocation6], 1 }
 0x1e1   :  { %430 = vsyncpa [#allocation9], 1 }
 0x1e2   :  { %431 = vsyncpa [#allocation4], 1 }

// kernel: tpu_custom_call.1
= control target key start
LH: loop header
LB: loop body
LE: loop exit
PB: predicated region body
PF: predicated region fallthrough
CT: control target
= control target key end

     0   :  { %9 = vsyncpa [#allocation3], 0  ;;  %s773_s0 = inlined_call_operand.hbm [shape: bf16[8,13], index: 0, kind: input, shape index: {}]   ;;  %s774_s1 = inlined_call_operand.hbm [shape: bf16[13,896], index: 1, kind: input, shape index: {}]   ;;  %s775_s2 = inlined_call_operand.hbm [shape: bf16[128,128], index: 2, kind: input, shape index: {}]   ;;  %s776_s3 = inlined_call_operand.hbm [shape: bf16[128,128], index: 3, kind: input, shape index: {}]   ;;  %s777_s4 = inlined_call_operand.hbm [shape: f32[8,128], index: 4, kind: output, shape index: {}]  }
   0x1   :  { %10 = vsyncpa [#allocation6], 0 }
   0x2   :  { %11 = vsyncpa [#allocation9], 0  ;;  %s28_s17 = sshll.u32 %s774_s1, 4  ;;  %s29_s17 = int_to_ptr.hbm [resolvable:$true] %s28_s17 }
   0x3   :  { %12 = vsyncpa [#allocation4], 0  ;;  %s698_s18 = smov [#allocation5]   ;;  %s18_s22 = sshll.u32 %s773_s0, 4  ;;  %s19_s22 = int_to_ptr.hbm [resolvable:$true] %s18_s22 }
   0x4   :  { %s30_s19 = sshll.u32 %s698_s18, 4  ;;  %s699_s23 = smov 448   ;;  %s31_s19 = int_to_ptr.vmem [resolvable:$true] %s30_s19 }
   0x5   :  { %s700_s24 = smov 28   ;;  %s701_s25 = smov [#allocation2]  }
   0x6   :  { %36 = dma.hbm_to_vmem [thread:$0]  %s29_s17, 896, %s31_s19, [#allocation6], %s699_s23, %s699_s23, %s700_s24  }
   0x7   :  { %s20_s26 = sshll.u32 %s701_s25, 4  ;;  %s41_s29 = sshll.u32 %s775_s2, 4  ;;  %s21_s26 = int_to_ptr.vmem [resolvable:$true] %s20_s26  ;;  %s42_s29 = int_to_ptr.hbm [resolvable:$true] %s41_s29 }
   0x8   :  { %23 = dma.hbm_to_vmem [thread:$0]  %s19_s22, 64, %s21_s26, [#allocation3]  }
   0x9   :  { %s702_s1 = smov [#allocation7]   ;;  %s54_s0 = sshll.u32 %s776_s3, 4  ;;  %s55_s0 = int_to_ptr.hbm [resolvable:$true] %s54_s0 }
   0xa   :  { %s43_s30 = sshll.u32 %s702_s1, 4  ;;  %s703_s7 = smov 64   ;;  %s44_s30 = int_to_ptr.vmem [resolvable:$true] %s43_s30 }
   0xb   :  { %s704_s8 = smov 4   ;;  %s705_s9 = smov [#allocation8]  }
   0xc   :  { %49 = dma.hbm_to_vmem [thread:$0]  %s42_s29, 1024, %s44_s30, [#allocation6], %s703_s7, %s703_s7, %s704_s8  }
   0xd   :  { %s56_s10 = sshll.u32 %s705_s9, 4  ;;  %s57_s10 = int_to_ptr.vmem [resolvable:$true] %s56_s10 }
   0xe   :  { %62 = dma.hbm_to_vmem [thread:$0]  %s55_s0, 1024, %s57_s10, [#allocation9], %s703_s7, %s703_s7, %s704_s8  }
   0xf   :  { %690 = dma.done.wait [#allocation3], 64  }
  0x10   :  { %691 = vsyncadd [#allocation3], 4294967232 }
  0x11   :  { %692 = dma.done.wait [#allocation6], 1920  }
  0x12   :  { %693 = vsyncadd [#allocation6], 4294965376 }
  0x13   :  { %694 = dma.done.wait [#allocation9], 1024  }
  0x14   :  { %695 = vsyncadd [#allocation9], 4294966272  ;;  %vm122_vm0 = vcmask 1045504   ;;  %vm123_vm1 = vcmask 1046528   ;;  %v706_v0 = vmov 65535   ;;  %vm118_vm2 = vcmask 105472  }
  0x15   :  { %v124_v1 = vsel %vm122_vm0, 4294967295, %v706_v0  ;;  %v434_v2 = vld [vmem:[#allocation5] sm:$0xf]  ;;  %v536_v3 = vld [vmem:[#allocation5 + $0x18] sm:$0x70]  ;;  %v547_v19 = vld [vmem:[#allocation7 + $0x38] sm:$0xff] }
  0x16   :  { %v745_v4 = vsel %vm123_vm1, %v124_v1, 0  ;;  %v435_v5 = vor.u32 %v536_v3, %v434_v2  ;;  %v533_v6 = vld [vmem:[#allocation5 + $0x4] sm:$0xf]  ;;  %v436_v7 = vld [vmem:[#allocation5 + $0x1c] sm:$0x70]  ;;  %v546_v21 = vld [vmem:[#allocation7 + $0x30] sm:$0xff] }
  0x17   :  { %v442_v8 = vld [vmem:[#allocation5 + $0x8] sm:$0xf]  ;;  %v439_v9 = vor.u32 %v533_v6, %v436_v7  ;;  %v537_v10 = vld [vmem:[#allocation5 + $0x20] sm:$0x70]  ;;  %v749_v14 = vld [vmem:[#allocation2] sm:$0xf] }
  0x18   :  { %v127_v11 = vand.u32 %v435_v5, %v745_v4  ;;  %v443_v12 = vor.u32 %v537_v10, %v442_v8  ;;  %v534_v16 = vld [vmem:[#allocation5 + $0xc] sm:$0xf]  ;;  %v444_v17 = vld [vmem:[#allocation5 + $0x24] sm:$0x70]  ;;  %v545_v22 = vld [vmem:[#allocation7 + $0x28] sm:$0xff]  ;;  %s707_s2 = smov [#allocation10]  }
  0x19   :  { %v130_v13 = vand.u32 %v439_v9, %v745_v4  ;;  %v447_v18 = vor.u32 %v534_v16, %v444_v17  ;;  %v544_v23 = vld [vmem:[#allocation7 + $0x20] sm:$0xff]  ;;  %v543_v24 = vld [vmem:[#allocation7 + $0x18] sm:$0xff]  ;;  %v542_v25 = vld [vmem:[#allocation7 + $0x10] sm:$0xff]  ;;  %s418_s3 = sshll.u32 %s707_s2, 4  ;;  %s420_s13 = sshll.u32 %s777_s4, 4  ;;  %s419_s3 = int_to_ptr.vmem [resolvable:$true] %s418_s3  ;;  %s421_s13 = int_to_ptr.hbm [resolvable:$true] %s420_s13 }
  0x1a   :  { %154 = vmatpush.bf16.msra.mxu1 %v127_v11  ;;  %v133_v15 = vand.u32 %v443_v12, %v745_v4  ;;  %v450_v26 = vld [vmem:[#allocation5 + $0x10] sm:$0xf]  ;;  %v538_v27 = vld [vmem:[#allocation5 + $0x28] sm:$0x70]  ;;  %v541_v28 = vld [vmem:[#allocation7 + $0x8] sm:$0xff] }
  0x1b   :  { %v136_v20 = vand.u32 %v447_v18, %v745_v4  ;;  %v451_v29 = vor.u32 %v538_v27, %v450_v26  ;;  %v540_v31 = vld [vmem:[#allocation7] sm:$0xff]  ;;  %v555_v46 = vld [vmem:[#allocation8 + $0x38] sm:$0xff]  ;;  %v554_v47 = vld [vmem:[#allocation8 + $0x30] sm:$0xff] }
  0x1c   :  { %180 = vmatpush.bf16.msra.mxu2 %v133_v15  ;;  %v458_v48 = vld [vmem:[#allocation5 + $0x18] sm:$0xf]  ;;  %v539_v49 = vld [vmem:[#allocation5 + $0x30] sm:$0x70]  ;;  %v553_v50 = vld [vmem:[#allocation8 + $0x28] sm:$0xff] }
  0x1d   :  { %460 = vmatmul.msk.bf16.vlgmr.msra.gmra.mxu1 %vm118_vm2, %v749_v14  ;;  %193 = vmatpush.bf16.msra.mxu3 %v136_v20  ;;  %v139_v30 = vand.u32 %v451_v29, %v745_v4  ;;  %v459_v51 = vor.u32 %v539_v49, %v458_v48  ;;  %v552_v57 = vld [vmem:[#allocation8 + $0x20] sm:$0xff]  ;;  %v551_v58 = vld [vmem:[#allocation8 + $0x18] sm:$0xff]  ;;  %v550_v63 = vld [vmem:[#allocation8 + $0x10] sm:$0xff] }
  0x1e   :  { %167 = vmatpush.bf16.msrb.mxu1 %v130_v13  ;;  %v535_v59 = vld [vmem:[#allocation5 + $0x14] sm:$0xf]  ;;  %v452_v60 = vld [vmem:[#allocation5 + $0x2c] sm:$0x70]  ;;  %v549_v0 = vld [vmem:[#allocation8 + $0x8] sm:$0xff] }
  0x1f   :  { %462 = vmatmul.msk.bf16.vlgmr.msra.gmra.mxu2 %vm118_vm2, %v749_v14  ;;  %206 = vmatpush.bf16.msra.mxu0 %v139_v30  ;;  %v145_v52 = vand.u32 %v459_v51, %v745_v4  ;;  %v455_v61 = vor.u32 %v535_v59, %v452_v60  ;;  %v548_v1 = vld [vmem:[#allocation8] sm:$0xff] }
  0x20   :  { %463 = vmatmul.msk.bf16.vlgmr.msra.gmra.mxu3 %vm118_vm2, %v749_v14 }
  0x21   :  { %311 = vmatpush.bf16.msrb.mxu3 %v547_v19  ;;  %232 = vmatpush.bf16.msrb.mxu2 %v145_v52  ;;  %v142_v62 = vand.u32 %v455_v61, %v745_v4 }
  0x22   :  { %464 = vmatmul.msk.bf16.vlgmr.msra.gmra.mxu0 %vm118_vm2, %v749_v14 }
  0x23   :  { %397 = vmatpush.bf16.msrb.mxu0 %v555_v46  ;;  %219 = vmatpush.bf16.msra.mxu1 %v142_v62 }
  0x25   :  { %312 = vmatpush.bf16.msrb.mxu3 %v546_v21 }
  0x27   :  { %398 = vmatpush.bf16.msrb.mxu0 %v554_v47 }
  0x29   :  { %313 = vmatpush.bf16.msrb.mxu3 %v545_v22 }
  0x2b   :  { %399 = vmatpush.bf16.msrb.mxu0 %v553_v50 }
  0x2d   :  { %461 = vmatmul.msk.bf16.vlgmr.msrb.gmra.mxu1 %vm118_vm2, %v749_v14  ;;  %314 = vmatpush.bf16.msrb.mxu3 %v544_v23 }
  0x2f   :  { %466 = vmatmul.msk.bf16.vlgmr.msrb.gmra.mxu2 %vm118_vm2, %v749_v14  ;;  %400 = vmatpush.bf16.msrb.mxu0 %v552_v57 }
  0x31   :  { %315 = vmatpush.bf16.msrb.mxu3 %v543_v24 }
  0x33   :  { %401 = vmatpush.bf16.msrb.mxu0 %v551_v58 }
  0x35   :  { %316 = vmatpush.bf16.msrb.mxu3 %v542_v25 }
  0x37   :  { %402 = vmatpush.bf16.msrb.mxu0 %v550_v63 }
  0x39   :  { %317 = vmatpush.bf16.msrb.mxu3 %v541_v28 }
  0x3b   :  { %403 = vmatpush.bf16.msrb.mxu0 %v549_v0 }
  0x3d   :  { %318 = vmatpush.bf16.msrb.mxu3 %v540_v31  ;;  %465 = vmatmul.msk.bf16.vlgmr.msra.gmra.mxu1 %vm118_vm2, %v749_v14 }
  0x3f   :  { %404 = vmatpush.bf16.msrb.mxu0 %v548_v1 }
  0x9a   :  { %v156_v32 = vpop.f32.mrf.mxu1 }
  0x9f   :  { %v208_v55 = vpop.f32.mrf.mxu0 }
  0xa2   :  { %v158_v33 = vpop.f32.mrf.mxu1  ;;  %v182_v34 = vpop.f32.mrf.mxu2 }
  0xa3   :  { %v195_v53 = vpop.f32.mrf.mxu3 }
  0xa7   :  { %v210_v56 = vpop.f32.mrf.mxu0 }
  0xaa   :  { %v169_v35 = vpop.f32.mrf.mxu1  ;;  %v184_v36 = vpop.f32.mrf.mxu2 }
  0xab   :  { %v238_v37 = vmul.f32 %v169_v35, %v156_v32  ;;  %v197_v54 = vpop.f32.mrf.mxu3 }
  0xad   :  { %v239_v38 = vadd.f32 %v238_v37, %v182_v34 }
  0xaf   :  { %v241_v39 = vmin.f32 %v239_v38, 0.0  ;;  %vm240_vm3 = vcmp.gt.f32.partialorder %v239_v38, 0.0 }
  0xb1   :  { %v242_v40 = vmul.f32 1.442695, %v241_v39 }
  0xb2   :  { %v171_v41 = vpop.f32.mrf.mxu1  ;;  %v234_v12 = vpop.f32.mrf.mxu2 }
  0xb3   :  { %566 = vpow2.f32 %v242_v40 }
  0xb9   :  { %v567_v42 = vpop.eup %566 }
  0xba   :  { %v467_v43 = vadd.f32 -1.0, %v567_v42  ;;  %v236_v13 = vpop.f32.mrf.mxu2  ;;  %v221_v15 = vpop.f32.mrf.mxu1 }
  0xbc   :  { %v245_v44 = vsel %vm240_vm3, %v239_v38, %v467_v43 }
  0xbd   :  { %v246_v45 = vpack.c.bf16 %v245_v44, %v245_v44 }
  0xbf   :  { %319 = vmatmul.bf16.vlgmr.msrb.gmra.mxu3 %v246_v45 }
  0xc2   :  { %v223_v14 = vpop.f32.mrf.mxu1 }
 0x142   :  { %v320_v2 = vpop.f32.mrf.mxu3 }
 0x143   :  { %v324_v3 = vmul.f32 %v320_v2, %v195_v53 }
 0x145   :  { %v325_v5 = vadd.f32 %v324_v3, %v208_v55 }
 0x147   :  { %v327_v6 = vmin.f32 %v325_v5, 0.0  ;;  %vm326_vm4 = vcmp.gt.f32.partialorder %v325_v5, 0.0 }
 0x149   :  { %v328_v7 = vmul.f32 1.442695, %v327_v6 }
 0x14a   :  { %v322_v8 = vpop.f32.mrf.mxu3 }
 0x14b   :  { %568 = vpow2.f32 %v328_v7 }
 0x151   :  { %v569_v9 = vpop.eup %568 }
 0x152   :  { %v500_v10 = vadd.f32 -1.0, %v569_v9 }
 0x154   :  { %v331_v4 = vsel %vm326_vm4, %v325_v5, %v500_v10 }
 0x155   :  { %v332_v11 = vpack.c.bf16 %v331_v4, %v331_v4 }
 0x157   :  { %405 = vmatmul.bf16.vlgmr.msrb.gmra.mxu0 %v332_v11 }
 0x1d4   :  { %v406_v16 = vpop.f32.mrf.mxu0 }
 0x1d5   :  { %v410_v17 = vmul.f32 %v406_v16, %v221_v15 }
 0x1d7   :  { %v411_v18 = vadd.f32 %v410_v17, %v234_v12 }
 0x1d9   :  { %412 = vst [vmem:[#allocation10] sm:$0xff] %v411_v18 }
 0x1da   :  { %423 = dma.vmem_to_hbm [thread:$0]  %s419_s3, 128, %s421_s13, [#allocation4]  }
 0x1dc   :  { %v408_v19 = vpop.f32.mrf.mxu0 }
 0x1dd   :  { %696 = dma.done.wait [#allocation4], 128  }
 0x1de   :  { %697 = vsyncadd [#allocation4], 4294967168 }
 0x1df   :  { %428 = vsyncpa [#allocation3], 1 }
 0x1e0   :  { %429 = vsyncpa [#allocation6], 1 }
 0x1e1   :  { %430 = vsyncpa [#allocation9], 1 }
 0x1e2   :  { %431 = vsyncpa [#allocation4], 1 }

</bundles_post_ra>
